<compile_context>
chip_gen: v7x
topology: tpu7x:2x2x1
jax: 0.10.0
libtpu: 0.0.40
codegen_flags: <defaults>
</compile_context>

<pallas_src>
import jax
import jax.numpy as jnp
from jax.experimental import pallas as pl
from jax.experimental.pallas import tpu as pltpu


def _round_up(x, m):
    return (x + m - 1) // m * m


def _mlp_kernel(xT_ref, consts_ref, w2_ref, o_ref):
    xT = xT_ref[...]                                   # (2, tb), batch in lanes
    x0 = xT[0:1, :]                                    # (1, tb)
    x1 = xT[1:2, :]                                    # (1, tb)

    c = consts_ref[...]                                # (128, 8) f32, packed consts
    w1c0 = c[:, 0:1]                                   # (128, 1)
    w1c1 = c[:, 1:2]
    b1 = c[:, 2:3]
    b2 = c[:, 3:4]
    w3c = c[:, 4:5]                                    # (128, 1)  == W3^T
    b3 = c[0:1, 5:6]                                   # (1, 1)

    # Layer 1 (in_features == 2): two broadcast FMAs on the VPU.
    h1 = jnp.maximum(w1c0 * x0 + w1c1 * x1 + b1, 0.0)  # (128, tb) f32

    # Layer 2: (128,128) @ (128,tb) on the MXU; w2 is pre-cast (bf16 default),
    # accumulation stays f32.
    h2 = jnp.dot(w2_ref[...], h1.astype(w2_ref.dtype),
                 preferred_element_type=jnp.float32)
    h2 = jnp.maximum(h2 + b2, 0.0)                     # (128, tb) f32

    # Layer 3 (out_features == 1): VPU multiply + cross-sublane reduce instead
    # of an M=1 MXU matmul; final scalar bias folded in here.
    out = jnp.sum(h2 * w3c, axis=0, keepdims=True) + b3   # (1, tb)
    o_ref[...] = out.astype(o_ref.dtype)


def mlp_forward(x, params, *, tb=None, mxu_dtype=jnp.bfloat16):
    """Forward pass matching the PyTorch MLP.

    x: (B, ...) -> flattened to (B, 2) like x.view(B, -1).
    params: PyTorch-layout weights: w1 (128,2), b1 (128,), w2 (128,128),
            b2 (128,), w3 (1,128), b3 (1,).
    mxu_dtype: bf16 by default (no TPU generation has a native f32 MXU);
               pass jnp.float32 for a bit-tighter (but slower) validation path.
    """
    B = x.shape[0]
    x2 = x.reshape(B, -1).astype(jnp.float32)
    assert x2.shape[1] == 2, f"MLP expects 2 input features, got {x2.shape[1]}"

    # Batch tile: multiple of 128 (lane width), large to amortize per-step
    # overhead, but capped so the grid keeps >=2 steps when possible (v7x has
    # 2 TensorCores that only see work through the 'parallel' grid axis).
    if tb is None:
        b128 = _round_up(B, 128)
        tb = max(128, min(min(4096, b128), _round_up(pl.cdiv(b128, 2), 128)))
    tb = _round_up(tb, 128)
    B_pad = _round_up(B, tb)

    # Single fused transpose+pad producing the lane-dense (2, B_pad) input.
    xT = jnp.pad(x2.T, ((0, 0), (0, B_pad - B)))       # (2, B_pad)

    # Pack all small per-feature constants into one (128, 8) ref:
    #   col 0: w1[:,0]  col 1: w1[:,1]  col 2: b1  col 3: b2
    #   col 4: w3^T     col 5: b3 (replicated)      cols 6-7: unused
    w1 = params["w1"].astype(jnp.float32)              # (128, 2)
    b1 = params["b1"].astype(jnp.float32)              # (128,)
    b2 = params["b2"].astype(jnp.float32)              # (128,)
    w3 = params["w3"].astype(jnp.float32).reshape(128)  # (128,)
    b3 = params["b3"].astype(jnp.float32).reshape(())   # scalar
    consts = jnp.stack(
        [w1[:, 0], w1[:, 1], b1, b2, w3,
         jnp.broadcast_to(b3, (128,)),
         jnp.zeros((128,), jnp.float32), jnp.zeros((128,), jnp.float32)],
        axis=1)                                        # (128, 8) f32

    # Pre-cast the dominant matmul weight in the wrapper (no per-step cast).
    w2 = params["w2"].astype(mxu_dtype)                # (128, 128)

    grid = (B_pad // tb,)

    outT = pl.pallas_call(
        _mlp_kernel,
        out_shape=jax.ShapeDtypeStruct((1, B_pad), jnp.float32),
        grid_spec=pltpu.PrefetchScalarGridSpec(
            num_scalar_prefetch=0,
            grid=grid,
            in_specs=[
                pl.BlockSpec((2, tb), lambda i: (0, i)),      # x^T tile (lane-dense)
                pl.BlockSpec((128, 8), lambda i: (0, 0)),     # packed constants
                pl.BlockSpec((128, 128), lambda i: (0, 0)),   # w2 (resident)
            ],
            out_specs=pl.BlockSpec((1, tb), lambda i: (0, i)),  # lane-dense output
        ),
        compiler_params=pltpu.CompilerParams(
            dimension_semantics=("parallel",),
            vmem_limit_bytes=32 * 1024 * 1024,
        ),
    )(xT, consts, w2)

    # Back to (B, 1); bias already applied in-kernel.
    return outT[0, :B].reshape(B, 1)


def init_params(key):
    """Deterministic init mimicking nn.Linear default (uniform +- 1/sqrt(fan_in)),
    stored in PyTorch layout: W (out, in), b (out,)."""
    k1, k2, k3, k4, k5, k6 = jax.random.split(key, 6)

    def lin(kw, kb, fan_in, fan_out):
        bound = 1.0 / jnp.sqrt(jnp.float32(fan_in))
        w = jax.random.uniform(kw, (fan_out, fan_in), jnp.float32, -bound, bound)
        b = jax.random.uniform(kb, (fan_out,), jnp.float32, -bound, bound)
        return w, b

    w1, b1 = lin(k1, k2, 2, 128)
    w2, b2 = lin(k3, k4, 128, 128)
    w3, b3 = lin(k5, k6, 128, 1)
    return {"w1": w1, "b1": b1, "w2": w2, "b2": b2, "w3": w3, "b3": b3}


if __name__ == "__main__":
    key = jax.random.PRNGKey(0)
    kx, kp = jax.random.split(key)

    B = 200  # not a multiple of 128 on purpose: exercises the padded-tile path
    x = jax.random.normal(kx, (B, 2), jnp.float32)
    params = init_params(kp)

    # Default (fast) bf16-MXU path and strict f32 validation path.
    out_bf16 = jax.block_until_ready(mlp_forward(x, params))
    out_f32 = jax.block_until_ready(mlp_forward(x, params, mxu_dtype=jnp.float32))

    # Reference in plain JAX (same math as the PyTorch module, W in (out, in)).
    h1 = jnp.maximum(x @ params["w1"].T + params["b1"], 0.0)
    h2 = jnp.maximum(h1 @ params["w2"].T + params["b2"], 0.0)
    ref = h2 @ params["w3"].T + params["b3"]

    assert out_f32.shape == (B, 1) and out_bf16.shape == (B, 1)
    err_f32 = float(jnp.max(jnp.abs(out_f32 - ref)))
    err_bf16 = float(jnp.max(jnp.abs(out_bf16 - ref)))
    assert jnp.allclose(out_f32, ref, atol=1e-4, rtol=1e-4), f"f32 max abs err {err_f32}"
    assert jnp.allclose(out_bf16, ref, atol=1e-1, rtol=5e-2), f"bf16 max abs err {err_bf16}"

    print("KERNEL_OK")
</pallas_src>

<mosaic_0001>
module attributes {stable_mosaic.version = 11 : i64} {
  func.func @_mlp_kernel(%arg0: i32, %arg1: memref<2x128xf32, #tpu.memory_space<vmem>>, %arg2: memref<128x8xf32, #tpu.memory_space<vmem>>, %arg3: memref<128x128xbf16, #tpu.memory_space<vmem>>, %arg4: memref<1x128xf32, #tpu.memory_space<vmem>>) attributes {dimension_semantics = [#tpu.dimension_semantics<parallel>], iteration_bounds = array<i64: 2>, scalar_prefetch = 0 : i64, scratch_operands = 0 : i64, tpu.core_type = #tpu.core_type<tc>, window_params = [{transform_indices = @transform_0, window_bounds = array<i64: 2, 128>}, {pipeline_mode = #tpu.pipeline_mode<synchronous>, transform_indices = @transform_1, window_bounds = array<i64: 128, 8>}, {pipeline_mode = #tpu.pipeline_mode<synchronous>, transform_indices = @transform_2, window_bounds = array<i64: 128, 128>}, {transform_indices = @transform_3, window_bounds = array<i64: 1, 128>}]} {
    %c0 = arith.constant 0 : index
    %c0_0 = arith.constant 0 : index
    %0 = vector.load %arg1[%c0, %c0_0] : memref<2x128xf32, #tpu.memory_space<vmem>>, vector<2x128xf32>
    %1 = vector.extract_strided_slice %0 {offsets = [0, 0], sizes = [1, 128], strides = [1, 1]} : vector<2x128xf32> to vector<1x128xf32>
    %2 = vector.extract_strided_slice %0 {offsets = [1, 0], sizes = [1, 128], strides = [1, 1]} : vector<2x128xf32> to vector<1x128xf32>
    %c0_1 = arith.constant 0 : index
    %c0_2 = arith.constant 0 : index
    %3 = vector.load %arg2[%c0_1, %c0_2] : memref<128x8xf32, #tpu.memory_space<vmem>>, vector<128x8xf32>
    %4 = vector.extract_strided_slice %3 {offsets = [0, 0], sizes = [128, 1], strides = [1, 1]} : vector<128x8xf32> to vector<128x1xf32>
    %5 = vector.extract_strided_slice %3 {offsets = [0, 1], sizes = [128, 1], strides = [1, 1]} : vector<128x8xf32> to vector<128x1xf32>
    %6 = vector.extract_strided_slice %3 {offsets = [0, 2], sizes = [128, 1], strides = [1, 1]} : vector<128x8xf32> to vector<128x1xf32>
    %7 = vector.extract_strided_slice %3 {offsets = [0, 3], sizes = [128, 1], strides = [1, 1]} : vector<128x8xf32> to vector<128x1xf32>
    %8 = vector.extract_strided_slice %3 {offsets = [0, 4], sizes = [128, 1], strides = [1, 1]} : vector<128x8xf32> to vector<128x1xf32>
    %9 = vector.extract_strided_slice %3 {offsets = [0, 5], sizes = [1, 1], strides = [1, 1]} : vector<128x8xf32> to vector<1x1xf32>
    %10 = vector.broadcast %4 : vector<128x1xf32> to vector<128x128xf32>
    %11 = vector.broadcast %1 : vector<1x128xf32> to vector<128x128xf32>
    %12 = arith.mulf %10, %11 : vector<128x128xf32>
    %13 = vector.broadcast %5 : vector<128x1xf32> to vector<128x128xf32>
    %14 = vector.broadcast %2 : vector<1x128xf32> to vector<128x128xf32>
    %15 = arith.mulf %13, %14 : vector<128x128xf32>
    %16 = arith.addf %12, %15 : vector<128x128xf32>
    %17 = vector.broadcast %6 : vector<128x1xf32> to vector<128x128xf32>
    %18 = arith.addf %16, %17 : vector<128x128xf32>
    %cst = arith.constant 0.000000e+00 : f32
    %19 = vector.broadcast %cst : f32 to vector<128x128xf32>
    %20 = arith.maximumf %18, %19 : vector<128x128xf32>
    %c0_3 = arith.constant 0 : index
    %c0_4 = arith.constant 0 : index
    %21 = vector.load %arg3[%c0_3, %c0_4] : memref<128x128xbf16, #tpu.memory_space<vmem>>, vector<128x128xbf16>
    %22 = arith.truncf %20 : vector<128x128xf32> to vector<128x128xbf16>
    %cst_5 = arith.constant dense<0.000000e+00> : vector<128x128xf32>
    %23 = tpu.matmul %21, %22, %cst_5 {dimension_numbers = #tpu.dot_dimension_numbers<[1], [0], [0], [1], [0, 0, 1, 1], [], []>} : vector<128x128xbf16>, vector<128x128xbf16>, vector<128x128xf32> -> vector<128x128xf32>
    %24 = vector.broadcast %7 : vector<128x1xf32> to vector<128x128xf32>
    %25 = arith.addf %23, %24 : vector<128x128xf32>
    %cst_6 = arith.constant 0.000000e+00 : f32
    %26 = vector.broadcast %cst_6 : f32 to vector<128x128xf32>
    %27 = arith.maximumf %25, %26 : vector<128x128xf32>
    %28 = vector.broadcast %8 : vector<128x1xf32> to vector<128x128xf32>
    %29 = arith.mulf %27, %28 : vector<128x128xf32>
    %cst_7 = arith.constant dense<0.000000e+00> : vector<128xf32>
    %30 = vector.multi_reduction <add>, %29, %cst_7 [0] : vector<128x128xf32> to vector<128xf32>
    %31 = vector.shape_cast %30 : vector<128xf32> to vector<1x128xf32>
    %32 = vector.broadcast %9 : vector<1x1xf32> to vector<1x128xf32>
    %33 = arith.addf %31, %32 : vector<1x128xf32>
    %c0_8 = arith.constant 0 : index
    %c0_9 = arith.constant 0 : index
    %34 = vector.load %arg4[%c0_8, %c0_9] : memref<1x128xf32, #tpu.memory_space<vmem>>, vector<1x128xf32>
    tpu.vector_store %arg4[%c0_8, %c0_9], %33 {strides = array<i32>} : memref<1x128xf32, #tpu.memory_space<vmem>>, vector<1x128xf32>,
    return
  }
  func.func @transform_0(%arg0: i32) -> (i32, i32) {
    %c0_i32 = arith.constant 0 : i32
    %c0_i32_0 = arith.constant 0 : i32
    return %c0_i32, %arg0 : i32, i32
  }
  func.func @transform_1(%arg0: i32) -> (i32, i32) {
    %c0_i32 = arith.constant 0 : i32
    %c0_i32_0 = arith.constant 0 : i32
    %c0_i32_1 = arith.constant 0 : i32
    return %c0_i32, %c0_i32_0 : i32, i32
  }
  func.func @transform_2(%arg0: i32) -> (i32, i32) {
    %c0_i32 = arith.constant 0 : i32
    %c0_i32_0 = arith.constant 0 : i32
    %c0_i32_1 = arith.constant 0 : i32
    return %c0_i32, %c0_i32_0 : i32, i32
  }
  func.func @transform_3(%arg0: i32) -> (i32, i32) {
    %c0_i32 = arith.constant 0 : i32
    %c0_i32_0 = arith.constant 0 : i32
    return %c0_i32, %arg0 : i32, i32
  }
}

</mosaic_0001>

<bundles_post_ra>
// kernel: tpu_custom_call.1
= control target key start
LH: loop header
LB: loop body
LE: loop exit
PB: predicated region body
PF: predicated region fallthrough
CT: control target
= control target key end

     0   :  { %8 = vsyncpa [#allocation3], 0  ;;  %s1561_s0 = inlined_call_operand.vmem [shape: f32[2,256], index: 0, kind: input, shape index: {}]   ;;  %s1562_s1 = inlined_call_operand.vmem [shape: f32[128,8], index: 1, kind: input, shape index: {}]   ;;  %s1563_s2 = inlined_call_operand.vmem [shape: bf16[128,128], index: 2, kind: input, shape index: {}]   ;;  %s1564_s3 = inlined_call_operand.hbm [shape: f32[1,256], index: 3, kind: output, shape index: {}]  }
   0x1   :  { %10 = vsyncpa [#allocation3 + $0x1], 0  ;;  %s1166_s12 = smov 0   ;;  %s1168_s13 = smov 0  }
   0x2   :  { %s1170_s14 = smov 0   ;;  %s1172_s15 = smov 0  }
   0x3 LB: > { %s1187_s16 = sadd.s32 4294967295, %s1137_s15   ;;  %s903_s17 = sadd.s32 4294967294, %s1137_s15   ;;  %s1137_s15 = sphi %s1172_s15, %s1570_s15   ;;  %s1133_s14 = sphi %s1170_s14, %s1569_s14   ;;  %s1129_s13 = sphi %s1168_s13, %s1568_s13   ;;  %s1125_s12 = sphi %s1166_s12, %s1567_s12  }
   0x4   : > { %s1191_s18 = sadd.s32 1, %s1137_s15   ;;  %s91_s19 = sadd.s32 1, %s1133_s14 }
   0x5   : > { %s88_s20 = ssub.s32 %s1137_s15, %s1191_s18  ;;  %p101_p0 = scmp.ne.s32.totalorder %s1133_s14, %s1129_s13 }
   0x6   : > { %p89_p1 = scmp.eq.s32.totalorder %s88_s20, 0  ;;  %p102_p2 = scmp.eq.s32.totalorder %s1187_s16, 1 }
   0x7   : > { %p107_p3 = scmp.ne.s32.totalorder %s1129_s13, %s1125_s12  ;;  %p108_p4 = scmp.eq.s32.totalorder %s903_s17, 1 }
   0x8   : > { %s1202_s21 = scalar_select %p89_p1, %s1133_s14, %s91_s19  }
   0x9   : > { %p1204_p5 = por %p102_p2, %p101_p0  ;;  %p1208_p6 = por %p108_p4, %p107_p3 }
   0xa   : > { %p906_p7 = scmp.ge.s32.totalorder %s1137_s15, 1  ;;  %p139_p8 = scmp.lt.s32.totalorder %s1137_s15, 3 }
   0xc   : > { %p140_p9 = pnand %p906_p7, %p139_p8 }
   0xd   : > { %v1217_v0 = vld [vmem:[%s1562_s1] sm:$0xff] (!%p140_p9)  ;;  %v1139_v1 = vmov (!%p140_p9), 1   ;;  %v1140_v2 = vmov (!%p140_p9), 0   ;;  %v1226_v3 = vld [vmem:[%s1562_s1 + $0x8] sm:$0xff] (!%p140_p9)  ;;  %v1231_v4 = vld [vmem:[%s1562_s1 + $0x10] sm:$0xff] (!%p140_p9)  ;;  %v1141_v7 = vmov (!%p140_p9), 2   ;;  %v263_v28 = vlaneseq (!%p140_p9) }
   0xe   : > { %143 = sbr.rel (%p140_p9) target bundleno = 573 (0x23d), region = 32  ;;  %1029 = vset.pattern.permute.xlu1 (!%p140_p9), %v1139_v1  ;;  %1028 = vset.pattern.permute.xlu0 (!%p140_p9), %v1140_v2  ;;  %v1238_v5 = vld [vmem:[%s1562_s1 + $0x18] sm:$0xff] (!%p140_p9)  ;;  %v1250_v6 = vld [vmem:[%s1562_s1 + $0x20] sm:$0xff] (!%p140_p9)  ;;  %v1257_v8 = vld [vmem:[%s1562_s1 + $0x30] sm:$0xff] (!%p140_p9)  ;;  %p161_p10 = scmp.lt.s32.totalorder (!%p140_p9), %s1187_s16, 1  ;;  %v1142_v45 = vmov (!%p140_p9), 3  }
   0xf   : > { %284 = vperm.xlu1 (!%p140_p9), %1029, %v1217_v0   ;;  %185 = vperm.xlu0 (!%p140_p9), %1028, %v1217_v0   ;;  %v1264_v9 = vld [vmem:[%s1562_s1 + $0x40] sm:$0xff] (!%p140_p9)  ;;  %v1272_v10 = vld [vmem:[%s1562_s1 + $0x28] sm:$0xff] (!%p140_p9)  ;;  %v1277_v11 = vld [vmem:[%s1562_s1 + $0x50] sm:$0xff] (!%p140_p9)  ;;  %v264_v33 = vshrl.u32 (!%p140_p9), %v263_v28, 7  ;;  %v1143_v46 = vmov (!%p140_p9), 4   ;;  %s159_s20 = sand.u32 (!%p140_p9), 1, %s1129_s13  }
  0x10   : > { %v1284_v12 = vld [vmem:[%s1562_s1 + $0x60] sm:$0xff] (!%p140_p9)  ;;  %v1292_v13 = vld [vmem:[%s1562_s1 + $0x70] sm:$0xff] (!%p140_p9)  ;;  %v1304_v14 = vld [vmem:[%s1562_s1 + $0x38] sm:$0xff] (!%p140_p9)  ;;  %s916_s24 = sshll.u32 (!%p140_p9), %s1187_s16, 4  ;;  %s836_s30 = scalar_lea.sflag (!%p140_p9), [#allocation3], %s159_s20 }
  0x11   : > { %v1317_v15 = vld [vmem:[%s1562_s1 + $0x48] sm:$0xff] (!%p140_p9)  ;;  %v1324_v16 = vld [vmem:[%s1562_s1 + $0x58] sm:$0xff] (!%p140_p9)  ;;  %v1067_v31 = vld [vmem:[%s1563_s2] sm:$0xff] (!%p140_p9)   ;;  %v349_v36 = vsub.s32 (!%p140_p9), 1, %v264_v33  ;;  %v265_v37 = vsub.s32 (!%p140_p9), 0, %v264_v33  ;;  %s1519_s29 = scalar_lea.hbm (!%p140_p9), %s1564_s3, %s916_s24 }
  0x12   : > { %v1331_v17 = vld [vmem:[%s1562_s1 + $0x68] sm:$0xff] (!%p140_p9)  ;;  %v1358_v18 = vld [vmem:[%s1562_s1 + $0x78] sm:$0xff] (!%p140_p9)  ;;  %v1068_v32 = vld [vmem:[%s1563_s2 + $0x20] sm:$0xff] (!%p140_p9)   ;;  %951 = vmatprep.mubr.bf16.mxu0 (!%p140_p9), %v1067_v31 }
  0x13   : > { %288 = vperm.xlu1 (!%p140_p9), %1029, %v1226_v3   ;;  %190 = vperm.xlu0 (!%p140_p9), %1028, %v1226_v3  }
  0x14   : > { %959 = vmatprep.mubr.bf16.mxu1 (!%p140_p9), %v1068_v32 }
  0x15   : > { %s162_s11 = scalar_select %p161_p10, %s1187_s16, 1 }
  0x16   : > { %s1145_s16 = smov [#allocation2]  }
  0x17   : > { %1030 = vset.pattern.permute.xlu1 %v1140_v2  ;;  %195 = vperm.xlu0 %1028, %v1231_v4   ;;  %s907_s25 = sshll.u32 %s162_s11, 1  ;;  %s1079_s5 = sshll.u32 %s1145_s16, 4  ;;  %s1080_s5 = int_to_ptr.vmem [resolvable:$false] %s1079_s5 }
  0x18   : > { %200 = vperm.xlu1 %1030, %v1238_v5   ;;  %s164_s28 = scalar_lea.vmem %s1561_s0, %s907_s25  ;;  %s160_s25 = scalar_lea.vmem [#allocation2], %s159_s20 }
  0x19   : > { %v166_v38 = vld [vmem:[%s164_s28] sm:$0x3]  ;;  %s848_s26 = sshll.u32 %s160_s25, 4  ;;  %s1081_s6 = scalar_lea.vmem %s1080_s5, 32  ;;  %s1521_s26 = int_to_ptr.vmem [resolvable:$true] %s848_s26 }
  0x1a   : > { %v1386_v41 = vrot.slane %v166_v38, %v349_v36  ;;  %v1388_v42 = vrot.slane %v166_v38, %v265_v37  ;;  %s1075_s4 = scalar_lea.vmem %s1521_s26, 16  ;;  %p1082_p0 = scmp.lt.s32.totalorder %s1521_s26, %s1080_s5 }
  0x1b   : > { %1031 = vset.pattern.permute.xlu0 %v1139_v1  ;;  %p1076_p11 = scmp.ne.s32.totalorder %s1521_s26, %s1075_s4  ;;  %p1083_p1 = scmp.lt.s32.totalorder %s1081_s6, %s1075_s4 }
  0x1c   : > { %1032 = vset.pattern.permute.xlu1 %v1139_v1  ;;  %292 = vperm.xlu0 %1031, %v1231_v4  }
  0x1d   : > { %296 = vperm.xlu1 %1032, %v1238_v5   ;;  %p1077_p12 = pnand %p1076_p11, %p1204_p5  ;;  %p1084_p2 = por %p1083_p1, %p1082_p0 }
  0x1f   : > { %p1078_p13 = pneg %p1077_p12 }
  0x20   : > { %300 = vperm.xlu0 %1031, %v1250_v6  }
  0x21   : > { %1033 = vset.pattern.permute.xlu1 %v1141_v7  ;;  %p1085_p3 = pnand %p1084_p2, %p1078_p13 }
  0x22   : > { %384 = vperm.xlu1 %1033, %v1217_v0  }
  0x24   : > { %308 = vperm.xlu0 %1031, %v1257_v8  }
  0x26   : > { %1034 = vset.pattern.permute.xlu1 %v1140_v2 }
  0x27   : > { %205 = vperm.xlu1 %1034, %v1250_v6  }
  0x28   : > { %316 = vperm.xlu0 %1031, %v1264_v9  }
  0x2b   : > { %210 = vperm.xlu1 %1034, %v1272_v10  }
  0x2c   : > { %324 = vperm.xlu0 %1031, %v1277_v11  }
  0x2f   : > { %1035 = vset.pattern.permute.xlu1 %v1139_v1 }
  0x30   : > { %304 = vperm.xlu1 %1035, %v1272_v10   ;;  %332 = vperm.xlu0 %1031, %v1284_v12  }
  0x34   : > { %1036 = vset.pattern.permute.xlu1 %v1141_v7  ;;  %340 = vperm.xlu0 %1031, %v1292_v13  }
  0x35   : > { %392 = vperm.xlu1 %1036, %v1231_v4  }
  0x38   : > { %1050 = vset.pattern.permute.xlu0 %v1141_v7 }
  0x39   : > { %1037 = vset.pattern.permute.xlu1 %v1140_v2  ;;  %388 = vperm.xlu0 %1050, %v1226_v3  }
  0x3a   : > { %215 = vperm.xlu1 %1037, %v1257_v8  }
  0x3d   : > { %396 = vperm.xlu0 %1050, %v1238_v5  }
  0x3e   : > { %220 = vperm.xlu1 %1037, %v1304_v14  }
  0x41   : > { %404 = vperm.xlu0 %1050, %v1272_v10  }
  0x42   : > { %1038 = vset.pattern.permute.xlu1 %v1139_v1 }
  0x43   : > { %312 = vperm.xlu1 %1038, %v1304_v14  }
  0x45   : > { %412 = vperm.xlu0 %1050, %v1304_v14  }
  0x47   : > { %1039 = vset.pattern.permute.xlu1 %v1141_v7 }
  0x48   : > { %400 = vperm.xlu1 %1039, %v1250_v6  }
  0x49   : > { %420 = vperm.xlu0 %1050, %v1317_v15  }
  0x4c   : > { %1040 = vset.pattern.permute.xlu1 %v1140_v2 }
  0x4d   : > { %225 = vperm.xlu1 %1040, %v1264_v9   ;;  %428 = vperm.xlu0 %1050, %v1324_v16  }
  0x51   : > { %230 = vperm.xlu1 %1040, %v1317_v15   ;;  %436 = vperm.xlu0 %1050, %v1331_v17  }
  0x55   : > { %1041 = vset.pattern.permute.xlu1 %v1139_v1  ;;  %1054 = vset.pattern.permute.xlu0 %v1143_v46 }
  0x56   : > { %320 = vperm.xlu1 %1041, %v1317_v15   ;;  %729 = vperm.xlu0 %1054, %v1217_v0  }
  0x5a   : > { %1042 = vset.pattern.permute.xlu1 %v1141_v7  ;;  %745 = vperm.xlu0 %1054, %v1250_v6  }
  0x5b   : > { %408 = vperm.xlu1 %1042, %v1257_v8  }
  0x5e   : > { %757 = vperm.xlu0 %1054, %v1304_v14  }
  0x5f   : > { %1043 = vset.pattern.permute.xlu1 %v1140_v2 }
  0x60   : > { %235 = vperm.xlu1 %1043, %v1277_v11  }
  0x62   : > { %769 = vperm.xlu0 %1054, %v1277_v11  }
  0x64   : > { %240 = vperm.xlu1 %1043, %v1324_v16  }
  0x66   : > { %1061 = vset.pattern.permute.xlu0 %v1142_v45 }
  0x67   : > { %504 = vperm.xlu0 %1061, %v1217_v0  }
  0x68   : > { %1044 = vset.pattern.permute.xlu1 %v1139_v1 }
  0x69   : > { %328 = vperm.xlu1 %1044, %v1324_v16  }
  0x6b   : > { %516 = vperm.xlu0 %1061, %v1238_v5  }
  0x6d   : > { %1045 = vset.pattern.permute.xlu1 %v1141_v7 }
  0x6e   : > { %416 = vperm.xlu1 %1045, %v1264_v9  }
  0x6f   : > { %524 = vperm.xlu0 %1061, %v1272_v10  }
  0x72   : > { %1046 = vset.pattern.permute.xlu1 %v1140_v2 }
  0x73   : > { %245 = vperm.xlu1 %1046, %v1284_v12   ;;  %536 = vperm.xlu0 %1061, %v1264_v9  }
  0x77   : > { %250 = vperm.xlu1 %1046, %v1331_v17   ;;  %548 = vperm.xlu0 %1061, %v1324_v16  }
  0x7b   : > { %1047 = vset.pattern.permute.xlu1 %v1139_v1  ;;  %560 = vperm.xlu0 %1061, %v1292_v13  }
  0x7c   : > { %336 = vperm.xlu1 %1047, %v1331_v17  }
  0x7f   : > { %1064 = vset.pattern.permute.xlu0 %v1143_v46 }
  0x80   : > { %1048 = vset.pattern.permute.xlu1 %v1141_v7  ;;  %781 = vperm.xlu0 %1064, %v1331_v17  }
  0x81   : > { %424 = vperm.xlu1 %1048, %v1277_v11  }
  0x85   : > { %1049 = vset.pattern.permute.xlu1 %v1140_v2 }
  0x86   : > { %255 = vperm.xlu1 %1049, %v1292_v13  }
  0x8a   : > { %260 = vperm.xlu1 %1049, %v1358_v18  }
  0x8e   : > { %1051 = vset.pattern.permute.xlu1 %v1139_v1  ;;  %v285_v19 = vpop.permute.xlu1 %284  ;;  %v186_v20 = vpop.permute.xlu0 %185 }
  0x8f   : > { %344 = vperm.xlu1 %1051, %v1358_v18   ;;  %v351_v47 = vmul.f32 %v1386_v41, %v285_v19  ;;  %v267_v48 = vmul.f32 %v1388_v42, %v186_v20 }
  0x91   : > { %v367_v55 = vadd.f32 %v351_v47, %v267_v48 }
  0x92   : > { %v289_v21 = vpop.permute.xlu1 %288  ;;  %v191_v22 = vpop.permute.xlu0 %190 }
  0x93   : > { %1052 = vset.pattern.permute.xlu1 %v1141_v7  ;;  %v352_v49 = vmul.f32 %v1386_v41, %v289_v21  ;;  %v268_v50 = vmul.f32 %v1388_v42, %v191_v22 }
  0x94   : > { %432 = vperm.xlu1 %1052, %v1284_v12  }
  0x95   : > { %v368_v59 = vadd.f32 %v352_v49, %v268_v50 }
  0x96   : > { %v196_v23 = vpop.permute.xlu0 %195 }
  0x97   : > { %v201_v24 = vpop.permute.xlu1 %200  ;;  %v269_v51 = vmul.f32 %v1388_v42, %v196_v23 }
  0x98   : > { %440 = vperm.xlu1 %1052, %v1292_v13   ;;  %v270_v61 = vmul.f32 %v1388_v42, %v201_v24 }
  0x9b   : > { %v293_v25 = vpop.permute.xlu0 %292 }
  0x9c   : > { %444 = vperm.xlu1 %1052, %v1358_v18   ;;  %v297_v26 = vpop.permute.xlu1 %296  ;;  %v353_v52 = vmul.f32 %v1386_v41, %v293_v25 }
  0x9d   : > { %v354_v56 = vmul.f32 %v1386_v41, %v297_v26 }
  0x9e   : > { %v369_v58 = vadd.f32 %v353_v52, %v269_v51 }
  0x9f   : > { %v1368_v27 = vpop.permute.xlu0 %300  ;;  %v370_v19 = vadd.f32 %v354_v56, %v270_v61 }
  0xa0   : > { %1053 = vset.pattern.permute.xlu1 %v1142_v45  ;;  %v355_v28 = vmul.f32 %v1386_v41, %v1368_v27 }
  0xa1   : > { %v385_v29 = vpop.permute.xlu1 %384  ;;  %508 = vperm.xlu1 %1053, %v1226_v3  }
  0xa2   : > { %v447_v57 = vadd.f32 %v385_v29, %v367_v55 }
  0xa3   : > { %v1371_v30 = vpop.permute.xlu0 %308 }
  0xa4   : > { %v463_v1 = vmax.f32 %v447_v57, 0.0  ;;  %v357_v49 = vmul.f32 %v1386_v41, %v1371_v30 }
  0xa5   : > { %512 = vperm.xlu1 %1053, %v1231_v4  }
  0xa6   : > { %v206_v34 = vpop.permute.xlu1 %205 }
  0xa7   : > { %v1382_v35 = vpop.permute.xlu0 %316  ;;  %v271_v29 = vmul.f32 %v1388_v42, %v206_v34 }
  0xa9   : > { %520 = vperm.xlu1 %1053, %v1250_v6   ;;  %v371_v36 = vadd.f32 %v355_v28, %v271_v29 }
  0xaa   : > { %v211_v39 = vpop.permute.xlu1 %210 }
  0xab   : > { %v1384_v40 = vpop.permute.xlu0 %324 }
  0xad   : > { %1055 = vset.pattern.permute.xlu1 %v1143_v46 }
  0xae   : > { %733 = vperm.xlu1 %1055, %v1226_v3   ;;  %v272_v3 = vmul.f32 %v1388_v42, %v211_v39 }
  0xaf   : > { %v305_v43 = vpop.permute.xlu1 %304  ;;  %v1390_v44 = vpop.permute.xlu0 %332 }
  0xb0   : > { %v356_v24 = vmul.f32 %v1386_v41, %v305_v43 }
  0xb2   : > { %737 = vperm.xlu1 %1055, %v1231_v4   ;;  %v372_v33 = vadd.f32 %v356_v24, %v272_v3  ;;  %v361_v24 = vmul.f32 %v1386_v41, %v1384_v40 }
  0xb3   : > { %v1402_v53 = vpop.permute.xlu0 %340 }
  0xb4   : > { %v393_v54 = vpop.permute.xlu1 %392 }
  0xb5   : > { %v449_v2 = vadd.f32 %v393_v54, %v369_v58 }
  0xb6   : > { %741 = vperm.xlu1 %1055, %v1238_v5  }
  0xb7   : > { %v465_v6 = vmax.f32 %v449_v2, 0.0 }
  0xb8   : > { %v389_v60 = vpop.permute.xlu0 %388 }
  0xb9   : > { %v448_v62 = vadd.f32 %v389_v60, %v368_v59  ;;  %v216_v63 = vpop.permute.xlu1 %215 }
  0xba   : > { %1056 = vset.pattern.permute.xlu1 %v1142_v45  ;;  %v273_v50 = vmul.f32 %v1388_v42, %v216_v63  ;;  %v359_v63 = vmul.f32 %v1386_v41, %v1382_v35 }
  0xbb   : > { %v464_v7 = vmax.f32 %v448_v62, 0.0  ;;  %528 = vperm.xlu1 %1056, %v1257_v8  }
  0xbc   : > { %v397_v20 = vpop.permute.xlu0 %396  ;;  %v373_v55 = vadd.f32 %v357_v49, %v273_v50 }
  0xbd   : > { %v495_v21 = vpack.c.bf16 %v464_v7, %v463_v1  ;;  %v450_v22 = vadd.f32 %v397_v20, %v370_v19  ;;  %v221_v23 = vpop.permute.xlu1 %220 }
  0xbe   : > { %v274_v48 = vmul.f32 %v1388_v42, %v221_v23 }
  0xbf   : > { %v466_v25 = vmax.f32 %v450_v22, 0.0  ;;  %935 = vmatprep.subr.bf16.mxu0 %v495_v21  ;;  %967 = vmatprep.subr.bf16.mxu1 %v495_v21 }
  0xc0   : > { %936 = vmatpush3.bf16.msra.mxu0 %v495_v21  ;;  %975 = vmatpush3.bf16.msra.mxu1 %v495_v21  ;;  %v405_v32 = vpop.permute.xlu0 %404 }
  0xc1   : > { %v496_v26 = vpack.c.bf16 %v466_v25, %v465_v6  ;;  %v452_v4 = vadd.f32 %v405_v32, %v372_v33  ;;  %532 = vperm.xlu1 %1056, %v1304_v14  }
  0xc2   : > { %v313_v31 = vpop.permute.xlu1 %312 }
  0xc3   : > { %937 = vmatprep.subr.bf16.mxu0 %v496_v26  ;;  %968 = vmatprep.subr.bf16.mxu1 %v496_v26  ;;  %v468_v34 = vmax.f32 %v452_v4, 0.0  ;;  %v358_v5 = vmul.f32 %v1386_v41, %v313_v31 }
  0xc4   : > { %938 = vmatpush3.bf16.msra.mxu0 %v496_v26  ;;  %976 = vmatpush3.bf16.msra.mxu1 %v496_v26  ;;  %v413_v14 = vpop.permute.xlu0 %412 }
  0xc5   : > { %1057 = vset.pattern.permute.xlu1 %v1143_v46  ;;  %v374_v51 = vadd.f32 %v358_v5, %v274_v48 }
  0xc6   : > { %749 = vperm.xlu1 %1057, %v1272_v10  }
  0xc7   : > { %v401_v27 = vpop.permute.xlu1 %400  ;;  %v454_v54 = vadd.f32 %v413_v14, %v374_v51 }
  0xc8   : > { %v451_v37 = vadd.f32 %v401_v27, %v371_v36 }
  0xc9   : > { %v470_v58 = vmax.f32 %v454_v54, 0.0 }
  0xca   : > { %v467_v38 = vmax.f32 %v451_v37, 0.0  ;;  %753 = vperm.xlu1 %1057, %v1257_v8   ;;  %v1144_v8 = vmov 5  }
  0xcb   : > { %1066 = vset.pattern.permute.xlu0 %v1144_v8  ;;  %v1073_v8 = vld [vmem:[%s1563_s2 + $0x18] sm:$0xff]  }
  0xcc   : > { %v497_v39 = vpack.c.bf16 %v468_v34, %v467_v38  ;;  %v226_v43 = vpop.permute.xlu1 %225  ;;  %830 = vperm.xlu0 %1066, %v1217_v0  }
  0xcd   : > { %v275_v1 = vmul.f32 %v1388_v42, %v226_v43  ;;  %v363_v43 = vmul.f32 %v1386_v41, %v1390_v44 }
  0xce   : > { %939 = vmatprep.subr.bf16.mxu0 %v497_v39  ;;  %969 = vmatprep.subr.bf16.mxu1 %v497_v39 }
  0xcf   : > { %940 = vmatpush3.bf16.msra.mxu0 %v497_v39  ;;  %977 = vmatpush3.bf16.msra.mxu1 %v497_v39  ;;  %v375_v20 = vadd.f32 %v359_v63, %v275_v1 }
  0xd0   : > { %v231_v47 = vpop.permute.xlu1 %230  ;;  %1058 = vset.pattern.permute.xlu1 %v1142_v45 }
  0xd1   : > { %540 = vperm.xlu1 %1058, %v1317_v15   ;;  %v276_v62 = vmul.f32 %v1388_v42, %v231_v47 }
  0xd5   : > { %v321_v52 = vpop.permute.xlu1 %320  ;;  %544 = vperm.xlu1 %1058, %v1277_v11   ;;  %v421_v11 = vpop.permute.xlu0 %420 }
  0xd6   : > { %v360_v61 = vmul.f32 %v1386_v41, %v321_v52 }
  0xd8   : > { %v376_v2 = vadd.f32 %v360_v61, %v276_v62  ;;  %v1074_v61 = vld [vmem:[%s1563_s2 + $0x38] sm:$0xff]  }
  0xd9   : > { %1059 = vset.pattern.permute.xlu1 %v1143_v46  ;;  %v429_v3 = vpop.permute.xlu0 %428 }
  0xda   : > { %v409_v56 = vpop.permute.xlu1 %408  ;;  %761 = vperm.xlu1 %1059, %v1264_v9   ;;  %v456_v19 = vadd.f32 %v421_v11, %v376_v2 }
  0xdb   : > { %v453_v57 = vadd.f32 %v409_v56, %v373_v55 }
  0xdc   : > { %v472_v22 = vmax.f32 %v456_v19, 0.0 }
  0xdd   : > { %v469_v59 = vmax.f32 %v453_v57, 0.0  ;;  %v437_v39 = vpop.permute.xlu0 %436 }
  0xde   : > { %765 = vperm.xlu1 %1059, %v1317_v15  }
  0xdf   : > { %v498_v10 = vpack.c.bf16 %v470_v58, %v469_v59  ;;  %v236_v30 = vpop.permute.xlu1 %235 }
  0xe0   : > { %v277_v26 = vmul.f32 %v1388_v42, %v236_v30  ;;  %v1071_v30 = vld [vmem:[%s1563_s2 + $0x10] sm:$0xff]  }
  0xe1   : > { %941 = vmatprep.subr.bf16.mxu0 %v498_v10  ;;  %970 = vmatprep.subr.bf16.mxu1 %v498_v10 }
  0xe2   : > { %942 = vmatpush3.bf16.msra.mxu0 %v498_v10  ;;  %978 = vmatpush3.bf16.msra.mxu1 %v498_v10  ;;  %v377_v32 = vadd.f32 %v361_v24, %v277_v26 }
  0xe3   : > { %v241_v60 = vpop.permute.xlu1 %240  ;;  %1060 = vset.pattern.permute.xlu1 %v1142_v45 }
  0xe4   : > { %552 = vperm.xlu1 %1060, %v1284_v12   ;;  %v278_v15 = vmul.f32 %v1388_v42, %v241_v60  ;;  %v1072_v60 = vld [vmem:[%s1563_s2 + $0x30] sm:$0xff]  }
  0xe8   : > { %v329_v7 = vpop.permute.xlu1 %328  ;;  %556 = vperm.xlu1 %1060, %v1331_v17  }
  0xe9   : > { %v362_v25 = vmul.f32 %v1386_v41, %v329_v7 }
  0xeb   : > { %v378_v28 = vadd.f32 %v362_v25, %v278_v15 }
  0xec   : > { %1062 = vset.pattern.permute.xlu1 %v1143_v46 }
  0xed   : > { %v417_v21 = vpop.permute.xlu1 %416  ;;  %773 = vperm.xlu1 %1062, %v1324_v16   ;;  %v458_v31 = vadd.f32 %v429_v3, %v378_v28 }
  0xee   : > { %v455_v0 = vadd.f32 %v417_v21, %v375_v20 }
  0xef   : > { %v474_v4 = vmax.f32 %v458_v31, 0.0 }
  0xf0   : > { %v471_v23 = vmax.f32 %v455_v0, 0.0 }
  0xf1   : > { %777 = vperm.xlu1 %1062, %v1284_v12  }
  0xf2   : > { %v499_v35 = vpack.c.bf16 %v472_v22, %v471_v23  ;;  %v246_v6 = vpop.permute.xlu1 %245  ;;  %v730_v22 = vpop.permute.xlu0 %729 }
  0xf3   : > { %v279_v34 = vmul.f32 %v1388_v42, %v246_v6 }
  0xf4   : > { %943 = vmatprep.subr.bf16.mxu0 %v499_v35  ;;  %971 = vmatprep.subr.bf16.mxu1 %v499_v35 }
  0xf5   : > { %944 = vmatpush3.bf16.msra.mxu0 %v499_v35  ;;  %979 = vmatpush3.bf16.msra.mxu1 %v499_v35  ;;  %v379_v5 = vadd.f32 %v363_v43, %v279_v34 }
  0xf6   : > { %v251_v9 = vpop.permute.xlu1 %250  ;;  %1063 = vset.pattern.permute.xlu1 %v1142_v45  ;;  %v746_v35 = vpop.permute.xlu0 %745 }
  0xf7   : > { %564 = vperm.xlu1 %1063, %v1358_v18   ;;  %v280_v12 = vmul.f32 %v1388_v42, %v251_v9 }
  0xfa   : > { %v1498_v9 = vpop.permute.xlu0 %757 }
  0xfb   : > { %v337_v29 = vpop.permute.xlu1 %336  ;;  %1065 = vset.pattern.permute.xlu1 %v1143_v46 }
  0xfc   : > { %v364_v37 = vmul.f32 %v1386_v41, %v337_v29  ;;  %785 = vperm.xlu1 %1065, %v1292_v13   ;;  %v365_v13 = vmul.f32 %v1386_v41, %v1402_v53 }
  0xfe   : > { %v380_v45 = vadd.f32 %v364_v37, %v280_v12  ;;  %v1502_v15 = vpop.permute.xlu0 %769 }
 0x100   : > { %v425_v17 = vpop.permute.xlu1 %424  ;;  %789 = vperm.xlu1 %1065, %v1358_v18   ;;  %v460_v47 = vadd.f32 %v437_v39, %v380_v45 }
 0x101   : > { %v457_v33 = vadd.f32 %v425_v17, %v377_v32 }
 0x102   : > { %v476_v50 = vmax.f32 %v460_v47, 0.0  ;;  %v505_v26 = vpop.permute.xlu0 %504 }
 0x103   : > { %v473_v36 = vmax.f32 %v457_v33, 0.0 }
 0x105   : > { %v500_v40 = vpack.c.bf16 %v474_v4, %v473_v36  ;;  %v256_v27 = vpop.permute.xlu1 %255 }
 0x106   : > { %v281_v46 = vmul.f32 %v1388_v42, %v256_v27  ;;  %v517_v29 = vpop.permute.xlu0 %516 }
 0x107   : > { %945 = vmatprep.subr.bf16.mxu0 %v500_v40  ;;  %972 = vmatprep.subr.bf16.mxu1 %v500_v40 }
 0x108   : > { %946 = vmatpush3.bf16.msra.mxu0 %v500_v40  ;;  %980 = vmatpush3.bf16.msra.mxu1 %v500_v40  ;;  %v381_v55 = vadd.f32 %v365_v13, %v281_v46 }
 0x109   : > { %v261_v16 = vpop.permute.xlu1 %260 }
 0x10a   : > { %v282_v18 = vmul.f32 %v1388_v42, %v261_v16  ;;  %v1070_v42 = vld [vmem:[%s1563_s2 + $0x28] sm:$0xff]  }
 0x10e   : > { %v345_v38 = vpop.permute.xlu1 %344 }
 0x10f   : > { %v366_v51 = vmul.f32 %v1386_v41, %v345_v38  ;;  %v1069_v41 = vld [vmem:[%s1563_s2 + $0x8] sm:$0xff]   ;;  %v525_v38 = vpop.permute.xlu0 %524 }
 0x111   : > { %v382_v44 = vadd.f32 %v366_v51, %v282_v18 }
 0x113   : > { %v433_v48 = vpop.permute.xlu1 %432 }
 0x114   : > { %v459_v49 = vadd.f32 %v433_v48, %v379_v5 }
 0x116   : > { %v475_v52 = vmax.f32 %v459_v49, 0.0 }
 0x117   : > { %v441_v14 = vpop.permute.xlu1 %440 }
 0x118   : > { %v501_v54 = vpack.c.bf16 %v476_v50, %v475_v52  ;;  %v461_v56 = vadd.f32 %v441_v14, %v381_v55 }
 0x11a   : > { %947 = vmatprep.subr.bf16.mxu0 %v501_v54  ;;  %973 = vmatprep.subr.bf16.mxu1 %v501_v54  ;;  %v477_v59 = vmax.f32 %v461_v56, 0.0 }
 0x11b   : > { %v445_v57 = vpop.permute.xlu1 %444  ;;  %948 = vmatpush3.bf16.msra.mxu0 %v501_v54  ;;  %981 = vmatpush3.bf16.msra.mxu1 %v501_v54 }
 0x11c   : > { %v462_v58 = vadd.f32 %v445_v57, %v382_v44 }
 0x11e   : > { %v478_v10 = vmax.f32 %v462_v58, 0.0 }
 0x120   : > { %v502_v53 = vpack.c.bf16 %v478_v10, %v477_v59  ;;  %v509_v62 = vpop.permute.xlu1 %508  ;;  %v537_v59 = vpop.permute.xlu0 %536 }
 0x122   : > { %949 = vmatprep.subr.bf16.mxu0 %v502_v53  ;;  %974 = vmatprep.subr.bf16.mxu1 %v502_v53 }
 0x123   : > { %950 = vmatpush3.bf16.msra.mxu0 %v502_v53  ;;  %982 = vmatpush3.bf16.msra.mxu1 %v502_v53 }
 0x124   : > { %v513_v63 = vpop.permute.xlu1 %512 }
 0x126   : > { %952 = vmatmul.mubr.bf16.vlgmr.msra.gmra.mrb[0].mxu0 %v1069_v41  ;;  %960 = vmatmul.mubr.bf16.vlgmr.msra.gmra.mrb[0].mxu1 %v1070_v42 }
 0x127   : > { %955 = vmatprep.mubr.bf16.mxu0 %v1071_v30  ;;  %963 = vmatprep.mubr.bf16.mxu1 %v1072_v60 }
 0x128   : > { %v521_v1 = vpop.permute.xlu1 %520 }
 0x12d   : > { %v734_v2 = vpop.permute.xlu1 %733 }
 0x12e   : > { %956 = vmatmul.mubr.bf16.gmra.mrb[4].mxu0 %v1073_v8  ;;  %964 = vmatmul.mubr.bf16.gmra.mrb[4].mxu1 %v1074_v61 }
 0x131   : > { %v738_v7 = vpop.permute.xlu1 %737 }
 0x135   : > { %v742_v11 = vpop.permute.xlu1 %741 }
 0x13a   : > { %v529_v19 = vpop.permute.xlu1 %528 }
 0x140   : > { %v533_v20 = vpop.permute.xlu1 %532 }
 0x145   : > { %v750_v21 = vpop.permute.xlu1 %749 }
 0x149   : > { %v1496_v0 = vpop.permute.xlu1 %753 }
 0x150   : > { %v541_v23 = vpop.permute.xlu1 %540 }
 0x154   : > { %v545_v6 = vpop.permute.xlu1 %544 }
 0x159   : > { %v1500_v25 = vpop.permute.xlu1 %761 }
 0x15d   : > { %v1504_v24 = vpop.permute.xlu1 %765 }
 0x163   : > { %v553_v28 = vpop.permute.xlu1 %552 }
 0x167   : > { %v1506_v3 = vpop.permute.xlu1 %556 }
 0x16c   : > { %v774_v47 = vpop.permute.xlu1 %773 }
 0x1f9   : > { %v953_v31 = vpop.f32.mrb[0].mxu0  ;;  %v961_v32 = vpop.f32.mrb[0].mxu1 }
 0x1fa   : > { %v649_v17 = vpop.f32.mrb[1].mxu0  ;;  %v681_v33 = vpop.f32.mrb[1].mxu1  ;;  %v658_v4 = vadd.f32 %v953_v31, %v513_v63 }
 0x1fb   : > { %v650_v36 = vadd.f32 %v649_v17, %v505_v26  ;;  %v954_v40 = vpop.f32.mrb[2].mxu0  ;;  %v962_v27 = vpop.f32.mrb[2].mxu1  ;;  %v682_v30 = vadd.f32 %v681_v33, %v537_v59 }
 0x1fc   : > { %v661_v16 = vadd.f32 %v954_v40, %v517_v29  ;;  %v652_v37 = vpop.f32.mrb[3].mxu0  ;;  %v684_v12 = vpop.f32.mrb[3].mxu1  ;;  %v714_v39 = vmax.f32 %v658_v4, 0.0 }
 0x1fd   : > { %v712_v34 = vmax.f32 %v650_v36, 0.0  ;;  %v653_v45 = vadd.f32 %v652_v37, %v509_v62  ;;  %v685_v63 = vadd.f32 %v684_v12, %v541_v23  ;;  %v720_v26 = vmax.f32 %v682_v30, 0.0  ;;  %v549_v31 = vpop.permute.xlu0 %548 }
 0x1fe   : > { %v715_v5 = vmax.f32 %v661_v16, 0.0  ;;  %v794_v52 = vmul.f32 %v738_v7, %v714_v39  ;;  %v693_v17 = vadd.f32 %v962_v27, %v549_v31 }
 0x1ff   : > { %v713_v43 = vmax.f32 %v653_v45, 0.0  ;;  %v792_v48 = vmul.f32 %v730_v22, %v712_v34  ;;  %v690_v22 = vadd.f32 %v961_v32, %v545_v6  ;;  %v721_v4 = vmax.f32 %v685_v63, 0.0 }
 0x200   : > { %v795_v44 = vmul.f32 %v742_v11, %v715_v5  ;;  %v723_v37 = vmax.f32 %v693_v17, 0.0 }
 0x201   : > { %v793_v46 = vmul.f32 %v734_v2, %v713_v43  ;;  %v957_v49 = vpop.f32.mrb[4].mxu0  ;;  %v965_v13 = vpop.f32.mrb[4].mxu1  ;;  %v722_v36 = vmax.f32 %v690_v22, 0.0 }
 0x202   : > { %v665_v50 = vpop.f32.mrb[5].mxu0  ;;  %v697_v51 = vpop.f32.mrb[5].mxu1  ;;  %v674_v18 = vadd.f32 %v957_v49, %v529_v19 }
 0x203   : > { %v808_v14 = vadd.f32 %v793_v46, %v792_v48  ;;  %v666_v54 = vadd.f32 %v665_v50, %v521_v1  ;;  %v958_v55 = vpop.f32.mrb[6].mxu0  ;;  %v966_v56 = vpop.f32.mrb[6].mxu1  ;;  %v698_v40 = vadd.f32 %v697_v51, %v553_v28  ;;  %v802_v12 = vmul.f32 %v1502_v15, %v722_v36 }
 0x204   : > { %v668_v57 = vpop.f32.mrb[7].mxu0  ;;  %v700_v58 = vpop.f32.mrb[7].mxu1  ;;  %v677_v41 = vadd.f32 %v958_v55, %v533_v20  ;;  %v718_v60 = vmax.f32 %v674_v18, 0.0 }
 0x205   : > { %v809_v10 = vadd.f32 %v808_v14, %v794_v52  ;;  %v716_v53 = vmax.f32 %v666_v54, 0.0  ;;  %v669_v42 = vadd.f32 %v668_v57, %v525_v38  ;;  %v778_v1 = vpop.permute.xlu1 %777  ;;  %v701_v32 = vadd.f32 %v700_v58, %v1506_v3 }
 0x206   : > { %v719_v7 = vmax.f32 %v677_v41, 0.0  ;;  %v798_v11 = vmul.f32 %v1496_v0, %v718_v60  ;;  %v561_v0 = vpop.permute.xlu0 %560  ;;  %v724_v34 = vmax.f32 %v698_v40, 0.0 }
 0x207   : > { %v796_v8 = vmul.f32 %v746_v35, %v716_v53  ;;  %v810_v61 = vadd.f32 %v809_v10, %v795_v44  ;;  %v717_v62 = vmax.f32 %v669_v42, 0.0  ;;  %v800_v35 = vmul.f32 %v1500_v25, %v720_v26 }
 0x208   : > { %v799_v20 = vmul.f32 %v1498_v9, %v719_v7  ;;  %v706_v27 = vadd.f32 %v965_v13, %v561_v0  ;;  %v803_v9 = vmul.f32 %v774_v47, %v723_v37  ;;  %v725_v39 = vmax.f32 %v701_v32, 0.0 }
 0x209   : > { %v811_v2 = vadd.f32 %v810_v61, %v796_v8  ;;  %v797_v19 = vmul.f32 %v750_v21, %v717_v62  ;;  %v565_v16 = vpop.permute.xlu1 %564  ;;  %v801_v21 = vmul.f32 %v1504_v24, %v721_v4  ;;  %v804_v48 = vmul.f32 %v778_v1, %v724_v34 }
 0x20a   : > { %v709_v38 = vadd.f32 %v966_v56, %v565_v16  ;;  %v782_v28 = vpop.permute.xlu0 %781  ;;  %v726_v5 = vmax.f32 %v706_v27, 0.0 }
 0x20b   : > { %v812_v29 = vadd.f32 %v811_v2, %v797_v19  ;;  %v805_v49 = vmul.f32 %v782_v28, %v725_v39 }
 0x20c   : > { %v727_v24 = vmax.f32 %v709_v38, 0.0 }
 0x20d   : > { %v813_v33 = vadd.f32 %v812_v29, %v798_v11  ;;  %v786_v25 = vpop.permute.xlu1 %785 }
 0x20e   : > { %v806_v51 = vmul.f32 %v786_v25, %v726_v5  ;;  %v831_v44 = vpop.permute.xlu0 %830 }
 0x20f   : > { %v814_v23 = vadd.f32 %v813_v33, %v799_v20 }
 0x211   : > { %v815_v6 = vadd.f32 %v814_v23, %v800_v35  ;;  %v790_v50 = vpop.permute.xlu1 %789 }
 0x212   : > { %v807_v13 = vmul.f32 %v790_v50, %v727_v24 }
 0x213   : > { %v816_v45 = vadd.f32 %v815_v6, %v801_v21 }
 0x215   : > { %v817_v43 = vadd.f32 %v816_v45, %v802_v12 }
 0x217   : > { %v818_v46 = vadd.f32 %v817_v43, %v803_v9 }
 0x219   : > { %v819_v3 = vadd.f32 %v818_v46, %v804_v48 }
 0x21b   : > { %v820_v15 = vadd.f32 %v819_v3, %v805_v49 }
 0x21d   : > { %v821_v52 = vadd.f32 %v820_v15, %v806_v51 }
 0x21f   : > { %v822_v14 = vadd.f32 %v821_v52, %v807_v13 }
 0x221   : > { %v823_v47 = vrot.slane %v822_v14, 4 }
 0x223   : > { %v824_v18 = vadd.f32 %v823_v47, %v822_v14 }
 0x225   : > { %v825_v54 = vrot.slane %v824_v18, 2 }
 0x227   : > { %v826_v55 = vadd.f32 %v825_v54, %v824_v18 }
 0x229   : > { %v827_v56 = vrot.slane %v826_v55, 1 }
 0x22b   : > { %v828_v57 = vadd.f32 %v827_v56, %v826_v55 }
 0x22d   : > { %v833_v58 = vadd.f32 %v831_v44, %v828_v57 }
 0x22f   : > { %834 = vst [vmem:[%s160_s25] sm:$0x1] %v833_v58 }
 0x230   : > { %1088 = shalt.err (!%p1085_p3)
}
 0x231   : > { %s1089_s7 = scalar_lea.hbm %s1519_s29, 16  ;;  %s1093_s10 = scalar_lea.hbm %s1564_s3, 32 }
 0x232   : > { %p1090_p4 = scmp.ne.s32.totalorder %s1519_s29, %s1089_s7  ;;  %p1094_p9 = scmp.lt.u32.totalorder %s1519_s29, %s1564_s3 }
 0x233   : > { %p1095_p10 = scmp.lt.u32.totalorder %s1093_s10, %s1089_s7  ;;  %p1097_p12 = scmp.lt.u32.totalorder %s1089_s7, %s1519_s29 }
 0x234   : > { %p1091_p7 = pnand %p1090_p4, %p1204_p5 }
 0x235   : > { %p1096_p11 = por %p1095_p10, %p1094_p9 }
 0x236   : > { %p1092_p8 = pneg %p1091_p7 }
 0x237   : > { %p1098_p13 = por %p1097_p12, %p1096_p11 }
 0x239   : > { %p1099_p0 = pnand %p1098_p13, %p1092_p8 }
 0x23b   : > { %1102 = shalt.err (!%p1099_p0)
}
 0x23c   : > { %983 = dma.vmem_to_hbm [thread:$0]  (%p1204_p5), %s1521_s26, 16, %s1519_s29, %s836_s30  }
 0x23d PF: > { %p989_p1 = scmp.ge.s32.totalorder %s1137_s15, 2  ;;  %s860_s19 = sand.u32 1, %s1125_s12  }
 0x23e   : > { %s861_s20 = scalar_lea.sflag [#allocation3], %s860_s19 }
 0x23f   : > { %p986_p2 = pnand %p989_p1, %p1208_p6 }
 0x241   : > { %1120 = dma.done.wait (!%p986_p2), %s861_s20, 16  }
 0x242   : > { %1122 = vsyncadd (!%p986_p2), %s861_s20, 4294967280  ;;  %p13_p3 = scmp.ge.s32.totalorder %s1191_s18, 4   ;;  %s1567_s12 = smov %s1129_s13 }
 0x243   : > { %s1568_s13 = smov %s1133_s14  ;;  %s1569_s14 = smov %s1202_s21 }
 0x244   : > { %s1570_s15 = smov %s1191_s18  ;;  %15 = sbr.rel (!%p13_p3) target bundleno = 3 (0x3), region = 67 }
 0x24b   :  { %865 = vsyncpa [#allocation3], 1 }
 0x24c   :  { %867 = vsyncpa [#allocation3 + $0x1], 1 }

</bundles_post_ra>
